<compile_context>
chip_gen: v7x
topology: tpu7x:2x2x1
jax: 0.10.0
libtpu: 0.0.40
codegen_flags: <defaults>
</compile_context>

<pallas_src>
import jax
import jax.numpy as jnp
from jax.experimental import pallas as pl
from jax.experimental.pallas import tpu as pltpu


# -----------------------------------------------------------------------------
# Fast path: literal pass-through (the faithful translation of Identity.forward)
# -----------------------------------------------------------------------------
def identity_forward(xx: jax.Array) -> jax.Array:
    """Identity.forward(xx) -> xx.  Zero cost: no kernel launch at all."""
    return xx


# -----------------------------------------------------------------------------
# Explicit-copy path: direct HBM->HBM DMA (no grid, no VMEM staging).
# -----------------------------------------------------------------------------
def _identity_dma_kernel(x_hbm_ref, o_hbm_ref, copy_sem):
    # Single whole-array DMA from the input HBM buffer to the output HBM
    # buffer.  No lane/sublane alignment constraints, no per-step overhead.
    cp = pltpu.make_async_copy(x_hbm_ref, o_hbm_ref, copy_sem)
    cp.start()
    cp.wait()


def identity_copy(xx: jax.Array) -> jax.Array:
    """Identity that materializes a fresh output buffer via a single HBM->HBM DMA."""
    if xx.size == 0:
        # Nothing to move; hand back the (empty) array as-is.
        return xx

    itemsize = jnp.dtype(xx.dtype).itemsize
    bytes_accessed = 2 * xx.size * itemsize  # read input + write output

    return pl.pallas_call(
        _identity_dma_kernel,
        out_shape=jax.ShapeDtypeStruct(xx.shape, xx.dtype),
        in_specs=[pl.BlockSpec(memory_space=pl.ANY)],
        out_specs=pl.BlockSpec(memory_space=pl.ANY),
        scratch_shapes=[pltpu.SemaphoreType.DMA],
        cost_estimate=pl.CostEstimate(
            flops=0, transcendentals=0, bytes_accessed=bytes_accessed
        ),
    )(xx)


# -----------------------------------------------------------------------------
# Opt-in alias path: zero-copy ONLY when the caller donates the input buffer.
# -----------------------------------------------------------------------------
def _identity_alias_kernel(x_hbm_ref, o_hbm_ref):
    # Output aliases the input buffer; the bytes are already in place.
    del x_hbm_ref, o_hbm_ref


def identity_alias(xx: jax.Array) -> jax.Array:
    """Aliased empty-kernel identity.

    Zero HBM traffic ONLY if the caller donates xx's buffer (jit donation);
    otherwise XLA inserts a defensive copy before the custom call.  Prefer
    identity_forward() unless you specifically need the aliased custom call.
    """
    return pl.pallas_call(
        _identity_alias_kernel,
        out_shape=jax.ShapeDtypeStruct(xx.shape, xx.dtype),
        in_specs=[pl.BlockSpec(memory_space=pl.ANY)],
        out_specs=pl.BlockSpec(memory_space=pl.ANY),
        input_output_aliases={0: 0},
    )(xx)


if __name__ == "__main__":
    key = jax.random.PRNGKey(0)
    x = jax.random.normal(key, (2, 4, 16, 16), dtype=jnp.float32)

    # Primary path: literal pass-through (zero cost, faithful to the module).
    y = identity_forward(x)
    jax.block_until_ready(y)
    assert y.shape == x.shape, (y.shape, x.shape)
    assert y.dtype == x.dtype, (y.dtype, x.dtype)
    assert bool(jnp.all(y == x)), "Identity (pass-through) output mismatch"

    # Explicit fresh-buffer copy path: single HBM->HBM DMA.
    y2 = identity_copy(x)
    jax.block_until_ready(y2)
    assert y2.shape == x.shape and y2.dtype == x.dtype
    assert bool(jnp.all(y2 == x)), "Identity (DMA copy path) output mismatch"

    # Non-128-aligned trailing dim: the DMA path has no lane-width requirement.
    x_odd = jax.random.normal(jax.random.PRNGKey(1), (3, 5, 7), dtype=jnp.bfloat16)
    y3 = identity_copy(x_odd)
    jax.block_until_ready(y3)
    assert y3.shape == x_odd.shape and y3.dtype == x_odd.dtype
    assert bool(jnp.all(y3 == x_odd)), "Identity (DMA copy, odd shape) mismatch"

    # Opt-in alias path (zero-copy only under buffer donation).
    y4 = identity_alias(x)
    jax.block_until_ready(y4)
    assert y4.shape == x.shape and y4.dtype == x.dtype
    assert bool(jnp.all(y4 == x)), "Identity (alias path) output mismatch"

    print("KERNEL_OK")
</pallas_src>

<mosaic_0001>
module attributes {stable_mosaic.version = 11 : i64} {
  func.func @_identity_dma_kernel(%arg0: memref<2x4x16x16xf32, #tpu.memory_space<any>>, %arg1: memref<2x4x16x16xf32, #tpu.memory_space<any>>, %arg2: memref<!tpu.dma_semaphore, #tpu.memory_space<semaphore_mem>>) attributes {dimension_semantics = [], scalar_prefetch = 0 : i64, scratch_operands = 1 : i64, tpu.core_type = #tpu.core_type<tc>} {
    tpu.enqueue_dma source(%arg0 : memref<2x4x16x16xf32, #tpu.memory_space<any>>) target(%arg1 : memref<2x4x16x16xf32, #tpu.memory_space<any>>) target_semaphore(%arg2 : memref<!tpu.dma_semaphore, #tpu.memory_space<semaphore_mem>>)
    tpu.wait_dma2 semaphore(%arg2 : memref<!tpu.dma_semaphore, #tpu.memory_space<semaphore_mem>>) src(%arg0 : memref<2x4x16x16xf32, #tpu.memory_space<any>>) dst(%arg1 : memref<2x4x16x16xf32, #tpu.memory_space<any>>)
    return
  }
}

</mosaic_0001>

<bundles_post_ra>
// kernel: tpu_custom_call.1
= control target key start
LH: loop header
LB: loop body
LE: loop exit
PB: predicated region body
PF: predicated region fallthrough
CT: control target
= control target key end

     0   :  { %s36_s6 = smov [#allocation2]   ;;  %s37_s7 = smov [#allocation3]   ;;  %s55_s0 = inlined_call_operand.hbm [shape: f32[2,4,16,16], index: 0, kind: input, shape index: {}]   ;;  %s56_s1 = inlined_call_operand.hbm [shape: f32[2,4,16,16], index: 1, kind: output, shape index: {}]  }
   0x1   :  { %s38_s8 = smov 0  }
   0x2   :  { %18 = dma.general %s55_s0, 2048, %s56_s1, %s36_s6, %s37_s7, [#allocation4], %s38_s8, 0  }
   0x3   :  { %34 = dma.done.wait [#allocation2], 2048 }
   0x4   :  { %35 = vsyncadd [#allocation2], 4294965248 }
   0x5   :  { %24 = vsyncmov [#allocation2] }
   0x8   :  { %s25_s13 = vpop.sfrf %24 }
   0x9   :  { %p30_p0 = scmp.ne.s32.totalorder %s25_s13, 0 }
   0xb   :  { %29 = shalt.err (%p30_p0)  }

</bundles_post_ra>
